<compile_context>
chip_gen: v6e
topology: v6e:2x2x1
jax: 0.10.0
libtpu: 0.0.40
codegen_flags: <defaults>
</compile_context>

<pallas_src>
import functools

import jax
import jax.numpy as jnp
from jax.experimental import pallas as pl
from jax.experimental.pallas import tpu as pltpu

LANE = 128
SUBLANE = 8
# TB=4096 => ~0.5 MiB state bufs + 4 MiB out bufs + ~8 MiB intermediates + 0.3 MiB
# weights: well under the 48 MiB limit below on all of v5e/v6e/v7x (64 MiB/TC on v7x).
DEFAULT_TB_MAX = 4096


def _round_up(x, m):
    return ((x + m - 1) // m) * m


def _pad_to(a, shape, fill=0.0):
    pads = [(0, t - s) for s, t in zip(a.shape, shape)]
    return jnp.pad(a, pads, constant_values=fill)


def _elu(x):
    # ELU (alpha=1.0). min() guard keeps the discarded branch finite (no exp overflow).
    return jnp.where(x > 0, x, jnp.exp(jnp.minimum(x, 0.0)) - 1.0)


def actor_kernel(state_ref, w1_ref, w23_ref, b_ref, out_ref):
    x = state_ref[...]                                                   # (TB, K)
    b = b_ref[...]                                                       # (3, F)

    # Layer 1: Linear(nb_state, 80) + ELU  (output lanes padded to F=128; pads stay 0)
    h1 = _elu(jnp.dot(x, w1_ref[...], preferred_element_type=jnp.float32)
              + b[0:1, :])                                               # (TB, F)

    # Layer 2: Linear(80, 40) + ELU (padded lanes stay 0)
    h2 = _elu(jnp.dot(h1, w23_ref[0], preferred_element_type=jnp.float32)
              + b[1:2, :])                                               # (TB, F)

    # Layer 3: Linear(40, dim_action) + softmax; padded logits get -1e30 -> exp()=0
    logits = (jnp.dot(h2, w23_ref[1], preferred_element_type=jnp.float32)
              + b[2:3, :])                                               # (TB, F)
    m = jnp.max(logits, axis=-1, keepdims=True)
    e = jnp.exp(logits - m)
    denom = jnp.sum(e, axis=-1, keepdims=True)
    r = pl.reciprocal(denom, approx=True)        # EUP slot (nearly free)
    r = r * (2.0 - denom * r)                    # one Newton step -> ~f32 accuracy
    out_ref[...] = e * r                         # lane-dense (TB, F) store


def prepare_actor_params(params):
    """Pad/pack the weights ONCE (call at init, not per forward step)."""
    w1, b1 = params["w1"], params["b1"]
    w2, b2 = params["w2"], params["b2"]
    w3, b3 = params["w3"], params["b3"]
    K = w1.shape[0]
    F = _round_up(max(w1.shape[1], w2.shape[1], w3.shape[1]), LANE)   # 128 here
    f32 = jnp.float32

    w1p = _pad_to(w1.astype(f32), (K, F))                 # (K, F)   K stays unpadded
    w2p = _pad_to(w2.astype(f32), (F, F))
    w3p = _pad_to(w3.astype(f32), (F, F))
    b1p = _pad_to(b1.reshape(1, -1).astype(f32), (1, F))
    b2p = _pad_to(b2.reshape(1, -1).astype(f32), (1, F))
    b3p = _pad_to(b3.reshape(1, -1).astype(f32), (1, F), fill=-1e30)  # kill padded softmax lanes

    return {
        "w1": w1p,                                        # (K, F)
        "w23": jnp.stack([w2p, w3p], axis=0),             # (2, F, F)
        "b": jnp.concatenate([b1p, b2p, b3p], axis=0),    # (3, F)
    }


@functools.partial(jax.jit, static_argnames=("dim_action", "tb_max"))
def actor_forward(state, prepared, *, dim_action, tb_max=DEFAULT_TB_MAX):
    """state: (B, nb_state) float32. prepared: output of prepare_actor_params."""
    state = state.astype(jnp.float32)
    B, K = state.shape
    w1, w23, b = prepared["w1"], prepared["w23"], prepared["b"]
    F = w1.shape[1]
    assert w1.shape[0] == K, "state feature dim must match prepared w1"

    # Batch tile: big enough to amortize per-step overhead, but sized so large B
    # yields >=2 grid tiles (so v7x's two TensorCores both get work). Always a
    # multiple of 8 sublanes; no batch padding — Pallas masks the ragged edge block.
    TB = _round_up(min(tb_max, -(-B // 2)), SUBLANE)
    grid = (pl.cdiv(B, TB),)

    flops = 2 * B * (K * F + F * F + F * F)
    transcendentals = B * 3 * F
    bytes_accessed = 4 * (B * (K + F) + K * F + 2 * F * F + 3 * F)

    out = pl.pallas_call(
        actor_kernel,
        out_shape=jax.ShapeDtypeStruct((B, F), jnp.float32),
        grid=grid,
        in_specs=[
            pl.BlockSpec((TB, K), lambda i: (i, 0)),        # state at true width, batch-tiled
            pl.BlockSpec((K, F), lambda i: (0, 0)),         # resident layer-1 weight
            pl.BlockSpec((2, F, F), lambda i: (0, 0, 0)),   # resident stacked w2/w3
            pl.BlockSpec((3, F), lambda i: (0, 0)),         # resident stacked biases
        ],
        out_specs=pl.BlockSpec((TB, F), lambda i: (i, 0)),  # lane-dense output slab
        compiler_params=pltpu.CompilerParams(
            dimension_semantics=("parallel",),              # shard batch tiles across TCs (v7x)
            vmem_limit_bytes=48 * 1024 * 1024,              # < 64 MiB/TC on v7x; ample on v5e/v6e
        ),
        cost_estimate=pl.CostEstimate(
            flops=flops, transcendentals=transcendentals, bytes_accessed=bytes_accessed),
    )(state, w1, w23, b)

    # Semantics of the module: return (B, dim_action) probabilities.
    return out[:, :dim_action]


def init_actor_params(key, nb_state, dim_action):
    """Deterministic synthetic parameters (PyTorch Linear-style uniform init),
    stored transposed: (in_features, out_features)."""
    def linear(k, fan_in, fan_out):
        kw, kb = jax.random.split(k)
        bound = 1.0 / jnp.sqrt(fan_in)
        w = jax.random.uniform(kw, (fan_in, fan_out), jnp.float32, -bound, bound)
        bb = jax.random.uniform(kb, (1, fan_out), jnp.float32, -bound, bound)
        return w, bb

    k1, k2, k3 = jax.random.split(key, 3)
    w1, b1 = linear(k1, nb_state, 80)
    w2, b2 = linear(k2, 80, 40)
    w3, b3 = linear(k3, 40, dim_action)
    return {"w1": w1, "b1": b1, "w2": w2, "b2": b2, "w3": w3, "b3": b3}


def actor_reference(state, p):
    """Pure-JAX reference for validation."""
    h1 = jax.nn.elu(state @ p["w1"] + p["b1"])
    h2 = jax.nn.elu(h1 @ p["w2"] + p["b2"])
    return jax.nn.softmax(h2 @ p["w3"] + p["b3"], axis=-1)


if __name__ == "__main__":
    key = jax.random.PRNGKey(0)
    k_params, k_state, k_state2 = jax.random.split(key, 3)

    B, nb_state, dim_action = 2, 16, 8
    params = init_actor_params(k_params, nb_state, dim_action)
    prepared = prepare_actor_params(params)   # pad/pack ONCE, reused across forwards

    # Small single-tile case (matches the module's typical single-state usage).
    state = jax.random.normal(k_state, (B, nb_state), jnp.float32)
    out = jax.block_until_ready(actor_forward(state, prepared, dim_action=dim_action))
    ref = actor_reference(state, params)
    assert out.shape == (B, dim_action)
    assert jnp.allclose(out, ref, atol=1e-5, rtol=1e-5), "mismatch vs reference (B=2)"
    assert jnp.allclose(jnp.sum(out, axis=-1), 1.0, atol=1e-5), "softmax rows must sum to 1"

    # Multi-tile + ragged-edge case: small tile forces a 3-step grid with a
    # partial last block (no batch padding anywhere).
    B2 = 20
    state2 = jax.random.normal(k_state2, (B2, nb_state), jnp.float32)
    out2 = jax.block_until_ready(
        actor_forward(state2, prepared, dim_action=dim_action, tb_max=8))
    ref2 = actor_reference(state2, params)
    assert out2.shape == (B2, dim_action)
    assert jnp.allclose(out2, ref2, atol=1e-5, rtol=1e-5), "mismatch vs reference (B=20)"
    assert jnp.allclose(jnp.sum(out2, axis=-1), 1.0, atol=1e-5), "softmax rows must sum to 1"

    print("KERNEL_OK")
</pallas_src>

<mosaic_0001>
module attributes {stable_mosaic.version = 11 : i64} {
  func.func @actor_kernel(%arg0: i32, %arg1: memref<8x16xf32, #tpu.memory_space<vmem>>, %arg2: memref<16x128xf32, #tpu.memory_space<vmem>>, %arg3: memref<2x128x128xf32, #tpu.memory_space<vmem>>, %arg4: memref<3x128xf32, #tpu.memory_space<vmem>>, %arg5: memref<8x128xf32, #tpu.memory_space<vmem>>) attributes {dimension_semantics = [#tpu.dimension_semantics<parallel>], iteration_bounds = array<i64: 1>, scalar_prefetch = 0 : i64, scratch_operands = 0 : i64, tpu.core_type = #tpu.core_type<tc>, window_params = [{transform_indices = @transform_0, window_bounds = array<i64: 8, 16>}, {pipeline_mode = #tpu.pipeline_mode<synchronous>, transform_indices = @transform_1, window_bounds = array<i64: 16, 128>}, {pipeline_mode = #tpu.pipeline_mode<synchronous>, transform_indices = @transform_2, window_bounds = array<i64: 2, 128, 128>}, {pipeline_mode = #tpu.pipeline_mode<synchronous>, transform_indices = @transform_3, window_bounds = array<i64: 3, 128>}, {transform_indices = @transform_4, window_bounds = array<i64: 8, 128>}]} {
    %c0 = arith.constant 0 : index
    %c0_0 = arith.constant 0 : index
    %0 = vector.load %arg1[%c0, %c0_0] : memref<8x16xf32, #tpu.memory_space<vmem>>, vector<8x16xf32>
    %c0_1 = arith.constant 0 : index
    %c0_2 = arith.constant 0 : index
    %1 = vector.load %arg4[%c0_1, %c0_2] : memref<3x128xf32, #tpu.memory_space<vmem>>, vector<3x128xf32>
    %c0_3 = arith.constant 0 : index
    %c0_4 = arith.constant 0 : index
    %2 = vector.load %arg2[%c0_3, %c0_4] : memref<16x128xf32, #tpu.memory_space<vmem>>, vector<16x128xf32>
    %cst = arith.constant dense<0.000000e+00> : vector<8x128xf32>
    %3 = tpu.matmul %0, %2, %cst {dimension_numbers = #tpu.dot_dimension_numbers<[1], [0], [0], [1], [0, 0, 1, 1], [], []>} : vector<8x16xf32>, vector<16x128xf32>, vector<8x128xf32> -> vector<8x128xf32>
    %4 = vector.extract_strided_slice %1 {offsets = [0, 0], sizes = [1, 128], strides = [1, 1]} : vector<3x128xf32> to vector<1x128xf32>
    %5 = vector.broadcast %4 : vector<1x128xf32> to vector<8x128xf32>
    %6 = arith.addf %3, %5 : vector<8x128xf32>
    %cst_5 = arith.constant 0.000000e+00 : f32
    %7 = vector.broadcast %cst_5 : f32 to vector<8x128xf32>
    %8 = arith.cmpf ogt, %6, %7 : vector<8x128xf32>
    %cst_6 = arith.constant 0.000000e+00 : f32
    %9 = vector.broadcast %cst_6 : f32 to vector<8x128xf32>
    %10 = arith.minimumf %6, %9 : vector<8x128xf32>
    %11 = math.exp %10 : vector<8x128xf32>
    %cst_7 = arith.constant 1.000000e+00 : f32
    %12 = vector.broadcast %cst_7 : f32 to vector<8x128xf32>
    %13 = arith.subf %11, %12 : vector<8x128xf32>
    %14 = arith.select %8, %6, %13 : vector<8x128xi1>, vector<8x128xf32>
    %c0_8 = arith.constant 0 : index
    %c0_9 = arith.constant 0 : index
    %c0_10 = arith.constant 0 : index
    %15 = vector.load %arg3[%c0_8, %c0_9, %c0_10] : memref<2x128x128xf32, #tpu.memory_space<vmem>>, vector<1x128x128xf32>
    %16 = vector.shape_cast %15 : vector<1x128x128xf32> to vector<128x128xf32>
    %cst_11 = arith.constant dense<0.000000e+00> : vector<8x128xf32>
    %17 = tpu.matmul %14, %16, %cst_11 {dimension_numbers = #tpu.dot_dimension_numbers<[1], [0], [0], [1], [0, 0, 1, 1], [], []>} : vector<8x128xf32>, vector<128x128xf32>, vector<8x128xf32> -> vector<8x128xf32>
    %18 = vector.extract_strided_slice %1 {offsets = [1, 0], sizes = [1, 128], strides = [1, 1]} : vector<3x128xf32> to vector<1x128xf32>
    %19 = vector.broadcast %18 : vector<1x128xf32> to vector<8x128xf32>
    %20 = arith.addf %17, %19 : vector<8x128xf32>
    %cst_12 = arith.constant 0.000000e+00 : f32
    %21 = vector.broadcast %cst_12 : f32 to vector<8x128xf32>
    %22 = arith.cmpf ogt, %20, %21 : vector<8x128xf32>
    %cst_13 = arith.constant 0.000000e+00 : f32
    %23 = vector.broadcast %cst_13 : f32 to vector<8x128xf32>
    %24 = arith.minimumf %20, %23 : vector<8x128xf32>
    %25 = math.exp %24 : vector<8x128xf32>
    %cst_14 = arith.constant 1.000000e+00 : f32
    %26 = vector.broadcast %cst_14 : f32 to vector<8x128xf32>
    %27 = arith.subf %25, %26 : vector<8x128xf32>
    %28 = arith.select %22, %20, %27 : vector<8x128xi1>, vector<8x128xf32>
    %c1 = arith.constant 1 : index
    %c0_15 = arith.constant 0 : index
    %c0_16 = arith.constant 0 : index
    %29 = vector.load %arg3[%c1, %c0_15, %c0_16] : memref<2x128x128xf32, #tpu.memory_space<vmem>>, vector<1x128x128xf32>
    %30 = vector.shape_cast %29 : vector<1x128x128xf32> to vector<128x128xf32>
    %cst_17 = arith.constant dense<0.000000e+00> : vector<8x128xf32>
    %31 = tpu.matmul %28, %30, %cst_17 {dimension_numbers = #tpu.dot_dimension_numbers<[1], [0], [0], [1], [0, 0, 1, 1], [], []>} : vector<8x128xf32>, vector<128x128xf32>, vector<8x128xf32> -> vector<8x128xf32>
    %32 = vector.extract_strided_slice %1 {offsets = [2, 0], sizes = [1, 128], strides = [1, 1]} : vector<3x128xf32> to vector<1x128xf32>
    %33 = vector.broadcast %32 : vector<1x128xf32> to vector<8x128xf32>
    %34 = arith.addf %31, %33 : vector<8x128xf32>
    %cst_18 = arith.constant dense<0xFF800000> : vector<8xf32>
    %35 = vector.multi_reduction <maximumf>, %34, %cst_18 [1] : vector<8x128xf32> to vector<8xf32>
    %36 = vector.shape_cast %35 : vector<8xf32> to vector<8x1xf32>
    %37 = vector.broadcast %36 : vector<8x1xf32> to vector<8x128xf32>
    %38 = arith.subf %34, %37 : vector<8x128xf32>
    %39 = math.exp %38 : vector<8x128xf32>
    %cst_19 = arith.constant dense<0.000000e+00> : vector<8xf32>
    %40 = vector.multi_reduction <add>, %39, %cst_19 [1] : vector<8x128xf32> to vector<8xf32>
    %41 = vector.shape_cast %40 : vector<8xf32> to vector<8x1xf32>
    %42 = tpu.reciprocal %41 {approx = true} : vector<8x1xf32> -> vector<8x1xf32>
    %43 = arith.mulf %41, %42 : vector<8x1xf32>
    %cst_20 = arith.constant 2.000000e+00 : f32
    %44 = vector.broadcast %cst_20 : f32 to vector<8x1xf32>
    %45 = arith.subf %44, %43 : vector<8x1xf32>
    %46 = arith.mulf %42, %45 : vector<8x1xf32>
    %47 = vector.broadcast %46 : vector<8x1xf32> to vector<8x128xf32>
    %48 = arith.mulf %39, %47 : vector<8x128xf32>
    %c0_21 = arith.constant 0 : index
    %c0_22 = arith.constant 0 : index
    %49 = vector.load %arg5[%c0_21, %c0_22] : memref<8x128xf32, #tpu.memory_space<vmem>>, vector<8x128xf32>
    tpu.vector_store %arg5[%c0_21, %c0_22], %48 {strides = array<i32>} : memref<8x128xf32, #tpu.memory_space<vmem>>, vector<8x128xf32>,
    return
  }
  func.func @transform_0(%arg0: i32) -> (i32, i32) {
    %c0_i32 = arith.constant 0 : i32
    %c0_i32_0 = arith.constant 0 : i32
    return %arg0, %c0_i32 : i32, i32
  }
  func.func @transform_1(%arg0: i32) -> (i32, i32) {
    %c0_i32 = arith.constant 0 : i32
    %c0_i32_0 = arith.constant 0 : i32
    %c0_i32_1 = arith.constant 0 : i32
    return %c0_i32, %c0_i32_0 : i32, i32
  }
  func.func @transform_2(%arg0: i32) -> (i32, i32, i32) {
    %c0_i32 = arith.constant 0 : i32
    %c0_i32_0 = arith.constant 0 : i32
    %c0_i32_1 = arith.constant 0 : i32
    %c0_i32_2 = arith.constant 0 : i32
    return %c0_i32, %c0_i32_0, %c0_i32_1 : i32, i32, i32
  }
  func.func @transform_3(%arg0: i32) -> (i32, i32) {
    %c0_i32 = arith.constant 0 : i32
    %c0_i32_0 = arith.constant 0 : i32
    %c0_i32_1 = arith.constant 0 : i32
    return %c0_i32, %c0_i32_0 : i32, i32
  }
  func.func @transform_4(%arg0: i32) -> (i32, i32) {
    %c0_i32 = arith.constant 0 : i32
    %c0_i32_0 = arith.constant 0 : i32
    return %arg0, %c0_i32 : i32, i32
  }
}

</mosaic_0001>

<bundles_post_ra>
// kernel: actor_forward.1
= control target key start
LH: loop header
LB: loop body
LE: loop exit
PB: predicated region body
PF: predicated region fallthrough
CT: control target
= control target key end

     0   :  { %9 = vsyncpa [#allocation3], 0  ;;  %s730_s0 = inlined_call_operand.hbm [shape: f32[2,16], index: 0, kind: input, shape index: {}]   ;;  %s731_s1 = inlined_call_operand.hbm [shape: f32[16,128], index: 1, kind: input, shape index: {}]   ;;  %s732_s2 = inlined_call_operand.hbm [shape: f32[2,128,128], index: 2, kind: input, shape index: {}]   ;;  %s733_s3 = inlined_call_operand.hbm [shape: f32[3,128], index: 3, kind: input, shape index: {}]   ;;  %s734_s4 = inlined_call_operand.hbm [shape: f32[2,128], index: 4, kind: output, shape index: {}]  }
   0x1   :  { %10 = vsyncpa [#allocation6], 0 }
   0x2   :  { %11 = vsyncpa [#allocation9], 0 }
   0x3   :  { %12 = vsyncpa [#allocation4], 0 }
   0x4   :  { %17 = vsyncadd [#allocation3], 96  ;;  %s622_s15 = smov [#allocation5]  }
   0x5   :  { %s30_s16 = sshll.u32 %s622_s15, 4  ;;  %s31_s16 = int_to_ptr.vmem [resolvable:$true] %s30_s16 }
   0x6   :  { %s522_s17 = scalar_lea.vmem %s31_s16, 256  ;;  %p527_p1 = scmp.lt.s32.totalorder %s31_s16, %s31_s16 }
   0x7   :  { %p523_p0 = scmp.ne.s32.totalorder %s31_s16, %s522_s17  ;;  %p528_p2 = scmp.lt.s32.totalorder %s522_s17, %s522_s17 }
   0x9   :  { %p529_p3 = por %p528_p2, %p527_p1 }
   0xb   :  { %p530_p4 = pnand %p529_p3, %p523_p0 }
   0xd   :  { %533 = shalt.err (!%p530_p4)
}
   0xe   :  { %s623_s18 = smov 128   ;;  %s624_s19 = smov 8  }
   0xf   :  { %36 = dma.hbm_to_vmem [thread:$0]  %s731_s1, 256, %s31_s16, [#allocation6], %s623_s18, %s623_s18, %s624_s19  }
  0x10   :  { %s625_s22 = smov [#allocation2]  }
  0x11   :  { %s18_s23 = sshll.u32 %s625_s22, 4  ;;  %s19_s23 = int_to_ptr.vmem [resolvable:$true] %s18_s23 }
  0x12   :  { %s542_s24 = scalar_lea.vmem %s19_s23, 32  ;;  %s546_s25 = scalar_lea.vmem %s19_s23, 128 }
  0x13   :  { %p543_p5 = scmp.ne.s32.totalorder %s19_s23, %s542_s24  ;;  %p547_p6 = scmp.lt.s32.totalorder %s19_s23, %s19_s23 }
  0x14   :  { %p548_p7 = scmp.lt.s32.totalorder %s546_s25, %s542_s24 }
  0x16   :  { %p549_p8 = por %p548_p7, %p547_p6 }
  0x18   :  { %p550_p9 = pnand %p549_p8, %p543_p5 }
  0x1a   :  { %553 = shalt.err (!%p550_p9)
}
  0x1b   :  { %s626_s26 = smov 32   ;;  %s627_s27 = smov 2  }
  0x1c   :  { %24 = dma.hbm_to_vmem [thread:$0]  %s730_s0, 32, %s19_s23, [#allocation3], %s626_s26, %s626_s26, %s627_s27  }
  0x1d   :  { %s628_s1 = smov [#allocation7]   ;;  %s629_s5 = smov [#allocation8]  }
  0x1e   :  { %s42_s30 = sshll.u32 %s628_s1, 4  ;;  %s55_s6 = sshll.u32 %s629_s5, 4  ;;  %s43_s30 = int_to_ptr.vmem [resolvable:$true] %s42_s30  ;;  %s56_s6 = int_to_ptr.vmem [resolvable:$true] %s55_s6 }
  0x1f   :  { %s562_s7 = scalar_lea.vmem %s43_s30, 4096  ;;  %p567_p11 = scmp.lt.s32.totalorder %s43_s30, %s43_s30 }
  0x20   :  { %p563_p10 = scmp.ne.s32.totalorder %s43_s30, %s562_s7  ;;  %p568_p12 = scmp.lt.s32.totalorder %s562_s7, %s562_s7 }
  0x22   :  { %p569_p13 = por %p568_p12, %p567_p11 }
  0x24   :  { %p570_p0 = pnand %p569_p13, %p563_p10 }
  0x26   :  { %573 = shalt.err (!%p570_p0)
}
  0x27   :  { %48 = dma.hbm_to_vmem [thread:$0]  %s732_s2, 4096, %s43_s30, [#allocation6], %s623_s18, %s623_s18, %s624_s19  }
  0x28   :  { %s582_s0 = scalar_lea.vmem %s56_s6, 64  ;;  %p587_p2 = scmp.lt.s32.totalorder %s56_s6, %s56_s6 }
  0x29   :  { %p583_p1 = scmp.ne.s32.totalorder %s56_s6, %s582_s0  ;;  %p588_p3 = scmp.lt.s32.totalorder %s582_s0, %s582_s0 }
  0x2b   :  { %p589_p4 = por %p588_p3, %p587_p2 }
  0x2d   :  { %p590_p5 = pnand %p589_p4, %p583_p1 }
  0x2f   :  { %593 = shalt.err (!%p590_p5)
}
  0x30   :  { %58 = dma.hbm_to_vmem [thread:$0]  %s733_s3, 64, %s56_s6, [#allocation9]  }
  0x31   :  { %614 = dma.done.wait [#allocation3], 128  }
  0x32   :  { %615 = vsyncadd [#allocation3], 4294967168 }
  0x33   :  { %616 = dma.done.wait [#allocation6], 4352  }
  0x34   :  { %617 = vsyncadd [#allocation6], 4294962944 }
  0x35   :  { %618 = dma.done.wait [#allocation9], 64  }
  0x36   :  { %619 = vsyncadd [#allocation9], 4294967232  ;;  %v630_v0 = vmov 0.0   ;;  %vm631_vm0 = vmmov 0   ;;  %v74_v1 = vld [vmem:[#allocation5 + $0x8] sm:$0xff]  ;;  %v73_v2 = vld [vmem:[#allocation5] sm:$0xff]  ;;  %v75_v24 = vlaneseq }
  0x37   :  { %418 = vmatprep.subr.mxu0 %v630_v0  ;;  %422 = vmatprep.mubr.msk.f32.mxu0 %vm631_vm0, %v630_v0  ;;  %v71_v3 = vld [vmem:[#allocation2] sm:$0xff]  ;;  %vm79_vm1 = vcmask 130048   ;;  %v174_v4 = vld [vmem:[#allocation7 + $0x78] sm:$0xff]  ;;  %v173_v5 = vld [vmem:[#allocation7 + $0x70] sm:$0xff] }
  0x38   :  { %425 = vmatprep.subr.mxu1 %v630_v0  ;;  %457 = vmatprep.mubr.msk.f32.mxu1 %vm631_vm0, %v630_v0  ;;  %v172_v6 = vld [vmem:[#allocation7 + $0x68] sm:$0xff]  ;;  %v171_v7 = vld [vmem:[#allocation7 + $0x60] sm:$0xff]  ;;  %v170_v8 = vld [vmem:[#allocation7 + $0x58] sm:$0xff]  ;;  %v708_v25 = vshrl.u32 %v75_v24, 7 }
  0x39   :  { %419 = vmatpush3.msra.mxu0 %v74_v1  ;;  %426 = vmatpush3.msra.mxu1 %v174_v4  ;;  %v169_v9 = vld [vmem:[#allocation7 + $0x50] sm:$0xff]  ;;  %v168_v10 = vld [vmem:[#allocation7 + $0x48] sm:$0xff]  ;;  %v167_v11 = vld [vmem:[#allocation7 + $0x40] sm:$0xff] }
  0x3a   :  { %420 = vmatprep.subr.mxu0 %v630_v0  ;;  %427 = vmatprep.subr.mxu1 %v630_v0  ;;  %v166_v12 = vld [vmem:[#allocation7 + $0x38] sm:$0xff]  ;;  %v165_v13 = vld [vmem:[#allocation7 + $0x30] sm:$0xff]  ;;  %v164_v14 = vld [vmem:[#allocation7 + $0x28] sm:$0xff]  ;;  %v77_v26 = vsub.s32 0, %v708_v25  ;;  %v177_v49 = vsub.s32 1, %v708_v25  ;;  %v274_v59 = vsub.s32 2, %v708_v25 }
  0x3b   :  { %421 = vmatpush3.msra.mxu0 %v73_v2  ;;  %428 = vmatpush3.msra.mxu1 %v173_v5  ;;  %v163_v15 = vld [vmem:[#allocation7 + $0x20] sm:$0xff]  ;;  %v162_v16 = vld [vmem:[#allocation7 + $0x18] sm:$0xff]  ;;  %v161_v17 = vld [vmem:[#allocation7 + $0x10] sm:$0xff] }
  0x3c   :  { %423 = vmatmul.mubr.msk.f32.vlgmr.msra.gmra.mxu0 %vm79_vm1, %v71_v3  ;;  %429 = vmatprep.subr.mxu1 %v630_v0  ;;  %v160_v18 = vld [vmem:[#allocation7 + $0x8] sm:$0xff]  ;;  %v159_v19 = vld [vmem:[#allocation7] sm:$0xff]  ;;  %v271_v20 = vld [vmem:[#allocation7 + $0xf8] sm:$0xff] }
  0x3d   :  { %460 = vmatprep.subr.mxu0 %v630_v0  ;;  %430 = vmatpush3.msra.mxu1 %v172_v6  ;;  %v270_v21 = vld [vmem:[#allocation7 + $0xf0] sm:$0xff]  ;;  %v269_v22 = vld [vmem:[#allocation7 + $0xe8] sm:$0xff]  ;;  %v268_v23 = vld [vmem:[#allocation7 + $0xe0] sm:$0xff] }
  0x3e   :  { %492 = vmatprep.mubr.msk.f32.mxu0 %vm631_vm0, %v630_v0  ;;  %431 = vmatprep.subr.mxu1 %v630_v0  ;;  %v72_v27 = vld [vmem:[#allocation8] sm:$0x7]  ;;  %v267_v37 = vld [vmem:[#allocation7 + $0xd8] sm:$0xff]  ;;  %v266_v38 = vld [vmem:[#allocation7 + $0xd0] sm:$0xff] }
  0x3f   :  { %432 = vmatpush3.msra.mxu1 %v171_v7  ;;  %461 = vmatpush3.msra.mxu0 %v271_v20  ;;  %v78_v28 = vrot.slane %v72_v27, %v77_v26  ;;  %v265_v39 = vld [vmem:[#allocation7 + $0xc8] sm:$0xff]  ;;  %v264_v40 = vld [vmem:[#allocation7 + $0xc0] sm:$0xff]  ;;  %v263_v41 = vld [vmem:[#allocation7 + $0xb8] sm:$0xff]  ;;  %v178_v50 = vrot.slane %v72_v27, %v177_v49  ;;  %v275_v60 = vrot.slane %v72_v27, %v274_v59 }
  0x40   :  { %433 = vmatprep.subr.mxu1 %v630_v0  ;;  %462 = vmatprep.subr.mxu0 %v630_v0  ;;  %v262_v42 = vld [vmem:[#allocation7 + $0xb0] sm:$0xff]  ;;  %v261_v43 = vld [vmem:[#allocation7 + $0xa8] sm:$0xff]  ;;  %v260_v44 = vld [vmem:[#allocation7 + $0xa0] sm:$0xff] }
  0x41   :  { %434 = vmatpush3.msra.mxu1 %v170_v8  ;;  %463 = vmatpush3.msra.mxu0 %v270_v21  ;;  %v259_v45 = vld [vmem:[#allocation7 + $0x98] sm:$0xff]  ;;  %v258_v46 = vld [vmem:[#allocation7 + $0x90] sm:$0xff]  ;;  %v257_v47 = vld [vmem:[#allocation7 + $0x88] sm:$0xff] }
  0x42   :  { %435 = vmatprep.subr.mxu1 %v630_v0  ;;  %464 = vmatprep.subr.mxu0 %v630_v0  ;;  %v256_v48 = vld [vmem:[#allocation7 + $0x80] sm:$0xff] }
  0x43   :  { %436 = vmatpush3.msra.mxu1 %v169_v9  ;;  %465 = vmatpush3.msra.mxu0 %v269_v22 }
  0x44   :  { %437 = vmatprep.subr.mxu1 %v630_v0  ;;  %466 = vmatprep.subr.mxu0 %v630_v0 }
  0x45   :  { %438 = vmatpush3.msra.mxu1 %v168_v10  ;;  %467 = vmatpush3.msra.mxu0 %v268_v23 }
  0x46   :  { %439 = vmatprep.subr.mxu1 %v630_v0  ;;  %468 = vmatprep.subr.mxu0 %v630_v0 }
  0x47   :  { %440 = vmatpush3.msra.mxu1 %v167_v11  ;;  %469 = vmatpush3.msra.mxu0 %v267_v37 }
  0x48   :  { %441 = vmatprep.subr.mxu1 %v630_v0  ;;  %470 = vmatprep.subr.mxu0 %v630_v0 }
  0x49   :  { %442 = vmatpush3.msra.mxu1 %v166_v12  ;;  %471 = vmatpush3.msra.mxu0 %v266_v38 }
  0x4a   :  { %443 = vmatprep.subr.mxu1 %v630_v0  ;;  %472 = vmatprep.subr.mxu0 %v630_v0 }
  0x4b   :  { %444 = vmatpush3.msra.mxu1 %v165_v13  ;;  %473 = vmatpush3.msra.mxu0 %v265_v39 }
  0x4c   :  { %445 = vmatprep.subr.mxu1 %v630_v0  ;;  %474 = vmatprep.subr.mxu0 %v630_v0 }
  0x4d   :  { %446 = vmatpush3.msra.mxu1 %v164_v14  ;;  %475 = vmatpush3.msra.mxu0 %v264_v40 }
  0x4e   :  { %447 = vmatprep.subr.mxu1 %v630_v0  ;;  %476 = vmatprep.subr.mxu0 %v630_v0 }
  0x4f   :  { %448 = vmatpush3.msra.mxu1 %v163_v15  ;;  %477 = vmatpush3.msra.mxu0 %v263_v41 }
  0x50   :  { %449 = vmatprep.subr.mxu1 %v630_v0  ;;  %478 = vmatprep.subr.mxu0 %v630_v0 }
  0x51   :  { %450 = vmatpush3.msra.mxu1 %v162_v16  ;;  %479 = vmatpush3.msra.mxu0 %v262_v42 }
  0x52   :  { %451 = vmatprep.subr.mxu1 %v630_v0  ;;  %480 = vmatprep.subr.mxu0 %v630_v0 }
  0x53   :  { %452 = vmatpush3.msra.mxu1 %v161_v17  ;;  %481 = vmatpush3.msra.mxu0 %v261_v43 }
  0x54   :  { %453 = vmatprep.subr.mxu1 %v630_v0  ;;  %482 = vmatprep.subr.mxu0 %v630_v0 }
  0x55   :  { %454 = vmatpush3.msra.mxu1 %v160_v18  ;;  %483 = vmatpush3.msra.mxu0 %v260_v44 }
  0x56   :  { %455 = vmatprep.subr.mxu1 %v630_v0  ;;  %484 = vmatprep.subr.mxu0 %v630_v0 }
  0x57   :  { %456 = vmatpush3.msra.mxu1 %v159_v19  ;;  %485 = vmatpush3.msra.mxu0 %v259_v45 }
  0x58   :  { %486 = vmatprep.subr.mxu0 %v630_v0 }
  0x59   :  { %487 = vmatpush3.msra.mxu0 %v258_v46 }
  0x5a   :  { %488 = vmatprep.subr.mxu0 %v630_v0 }
  0x5b   :  { %489 = vmatpush3.msra.mxu0 %v257_v47 }
  0x5c   :  { %490 = vmatprep.subr.mxu0 %v630_v0 }
  0x5d   :  { %491 = vmatpush3.msra.mxu0 %v256_v48 }
  0xfc   :  { %v149_v29 = vpop.f32.mrf.mxu0 }
  0xfd   :  { %v150_v30 = vadd.f32 %v149_v29, %v78_v28 }
  0xfe   :  { %v424_v31 = vpop.f32.mrf.mxu0 }
  0xff   :  { %v154_v32 = vmin.f32 %v150_v30, 0.0  ;;  %vm153_vm2 = vcmp.gt.f32.partialorder %v150_v30, 0.0 }
 0x101   :  { %v155_v33 = vmul.f32 1.442695, %v154_v32 }
 0x103   :  { %506 = vpow2.f32 %v155_v33 }
 0x110   :  { %v507_v34 = vpop.eup %506 }
 0x111   :  { %v379_v35 = vadd.f32 -1.0, %v507_v34 }
 0x113   :  { %v158_v36 = vsel %vm153_vm2, %v150_v30, %v379_v35 }
 0x114   :  { %458 = vmatmul.mubr.f32.vlgmr.msra.gmra.mxu1 %v158_v36 }
 0x1d4   :  { %v245_v51 = vpop.f32.mrf.mxu1 }
 0x1d5   :  { %v246_v52 = vadd.f32 %v245_v51, %v178_v50 }
 0x1d6   :  { %v459_v53 = vpop.f32.mrf.mxu1 }
 0x1d7   :  { %v250_v54 = vmin.f32 %v246_v52, 0.0  ;;  %vm249_vm3 = vcmp.gt.f32.partialorder %v246_v52, 0.0 }
 0x1d9   :  { %v251_v55 = vmul.f32 1.442695, %v250_v54 }
 0x1db   :  { %508 = vpow2.f32 %v251_v55 }
 0x1e8   :  { %v509_v56 = vpop.eup %508 }
 0x1e9   :  { %v380_v57 = vadd.f32 -1.0, %v509_v56 }
 0x1eb   :  { %v254_v58 = vsel %vm249_vm3, %v246_v52, %v380_v57 }
 0x1ec   :  { %493 = vmatmul.mubr.f32.vlgmr.msra.gmra.mxu0 %v254_v58 }
 0x2ac   :  { %v342_v61 = vpop.f32.mrf.mxu0 }
 0x2ad   :  { %v343_v62 = vadd.f32 %v342_v61, %v275_v60 }
 0x2ae   :  { %v494_v63 = vpop.f32.mrf.mxu0 }
 0x2af   :  { %346 = vmax.xlane.f32.xlu0 %v343_v62 }
 0x338   :  { %v347_v0 = vpop.xlane.xlu0 %346 }
 0x339   :  { %v348_v1 = vsub.f32 %v343_v62, %v347_v0 }
 0x33b   :  { %v349_v2 = vmul.f32 1.442695, %v348_v1 }
 0x33d   :  { %510 = vpow2.f32 %v349_v2 }
 0x34a   :  { %v511_v3 = vpop.eup %510 }
 0x34b   :  { %351 = vadd.xlane.f32.xlu0 %v511_v3 }
 0x3d4   :  { %v352_v4 = vpop.xlane.xlu0 %351 }
 0x3d5   :  { %512 = vrcp.f32 %v352_v4 }
 0x3e2   :  { %v513_v5 = vpop.eup %512 }
 0x3e3   :  { %v354_v6 = vmul.f32 %v513_v5, %v352_v4 }
 0x3e5   :  { %v355_v7 = vsub.f32 2.0, %v354_v6 }
 0x3e7   :  { %v356_v8 = vmul.f32 %v513_v5, %v355_v7 }
 0x3e9   :  { %v357_v9 = vmul.f32 %v511_v3, %v356_v8 }
 0x3eb   :  { %358 = vst [vmem:[#allocation10] sm:$0xff] %v357_v9 }
 0x3ec   :  { %363 = vsyncadd [#allocation4], 96  ;;  %s632_s2 = smov [#allocation10]  }
 0x3ed   :  { %s364_s3 = sshll.u32 %s632_s2, 4  ;;  %s365_s3 = int_to_ptr.vmem [resolvable:$true] %s364_s3 }
 0x3ee   :  { %s594_s12 = scalar_lea.vmem %s365_s3, 32  ;;  %s598_s13 = scalar_lea.vmem %s365_s3, 128 }
 0x3ef   :  { %p595_p6 = scmp.ne.s32.totalorder %s365_s3, %s594_s12  ;;  %p599_p7 = scmp.lt.s32.totalorder %s365_s3, %s365_s3 }
 0x3f0   :  { %p600_p8 = scmp.lt.s32.totalorder %s598_s13, %s594_s12 }
 0x3f2   :  { %p601_p9 = por %p600_p8, %p599_p7 }
 0x3f4   :  { %p602_p10 = pnand %p601_p9, %p595_p6 }
 0x3f6   :  { %605 = shalt.err (!%p602_p10)
}
 0x3f7   :  { %370 = dma.vmem_to_hbm [thread:$0]  %s365_s3, 32, %s734_s4, [#allocation4], %s626_s26, %s626_s26, %s627_s27  }
 0x3f8   :  { %620 = dma.done.wait [#allocation4], 128  }
 0x3f9   :  { %621 = vsyncadd [#allocation4], 4294967168 }
 0x3fa   :  { %374 = vsyncpa [#allocation3], 1 }
 0x3fb   :  { %375 = vsyncpa [#allocation6], 1 }
 0x3fc   :  { %376 = vsyncpa [#allocation9], 1 }
 0x3fd   :  { %377 = vsyncpa [#allocation4], 1 }

</bundles_post_ra>
